<compile_context>
chip_gen: v7x
topology: tpu7x:2x2x1
jax: 0.10.0
libtpu: 0.0.40
codegen_flags: <defaults>
</compile_context>

<pallas_src>
import jax
import jax.numpy as jnp
from jax import lax
from jax.experimental import pallas as pl
from jax.experimental.pallas import tpu as pltpu


def fcnn_kernel(x_ref, w1_ref, b1_ref, w2_ref, b2_ref, o_ref, acc_ref):
    # x_ref:  (BN, BD)  bf16 flattened-input tile (batch x feature-chunk), features on lanes
    # w1_ref: (BD, HH)  bf16 fc1 weight chunk (torch (HH, D) pre-transposed to (D, HH))
    # b1_ref: (1, HH)   f32 fc1 bias row
    # w2_ref: (1, HH)   f32 fc2 weight row (torch Linear(HH, 1) weight)
    # b2_ref: (1,)      f32 fc2 bias scalar, SMEM
    # o_ref:  (1, BN)   sigmoid output, batch on the lane axis (lane-dense store)
    # acc_ref:(BN, HH)  f32 accumulator, resident across the k (reduction) grid axis
    k = pl.program_id(1)

    @pl.when(k == 0)
    def _():
        acc_ref[...] = jnp.zeros_like(acc_ref)

    # fc1 partial contraction on the MXU (bf16 inputs, f32 accumulate).
    acc_ref[...] += jnp.dot(x_ref[...], w1_ref[...],
                            preferred_element_type=jnp.float32)

    @pl.when(k == pl.num_programs(1) - 1)
    def _():
        # activation: ReLU (choice for the `activation` ctor arg)
        h = jnp.maximum(acc_ref[...] + b1_ref[...], 0.0)              # (BN, HH) f32
        # fc2 fused into the epilogue: contract HH of (1,HH) with HH of (BN,HH)
        # -> (1, BN), batch on lanes.  No materialized h.T (avoids XLU transpose).
        z = lax.dot_general(w2_ref[...], h,
                            dimension_numbers=(((1,), (1,)), ((), ())),
                            preferred_element_type=jnp.float32) + b2_ref[0]
        # numerically stable sigmoid (no inf intermediate for very negative z)
        ez = jnp.exp(-jnp.abs(z))
        y = jnp.where(z >= 0.0, 1.0 / (1.0 + ez), ez / (1.0 + ez))
        o_ref[...] = y.astype(o_ref.dtype)


def _num_tensorcores():
    """Best-effort detection of multi-TensorCore chips (v7x-style megacore)."""
    try:
        dk = jax.devices()[0].device_kind.lower()
    except Exception:
        return 1
    return 2 if "v7" in dk else 1


def fcnn_forward(x, w1, b1, w2, b2, *, vmem_stream_budget=24 * 1024 * 1024):
    """x: (N, *input_shape); w1: (HH, D); b1: (HH,); w2: (1, HH); b2: (1,).
    Returns sigmoid(fc2(relu(fc1(flatten(x))))) with shape (N, 1)."""
    N = x.shape[0]
    x2d = x.reshape(N, -1)                       # flatten: pure reshape, no transpose
    D = x2d.shape[1]
    HH = w1.shape[0]
    assert w1.shape == (HH, D) and b1.shape == (HH,)
    assert w2.shape == (1, HH) and b2.shape == (1,)

    # ---- batch blocking ---------------------------------------------------
    # Pad batch up to a multiple of 8 (sublane granularity).
    N_pad = ((N + 7) // 8) * 8
    cores = _num_tensorcores()
    # On multi-TC chips, split the batch into one 128-aligned block per core when
    # the padded batch is large enough; otherwise (and on v5e/v6e) one big block.
    if cores > 1 and N_pad % (128 * cores) == 0 and N_pad >= 128 * cores:
        BN = N_pad // cores
    else:
        BN = N_pad
    if N_pad != N:
        x2d = jnp.pad(x2d, ((0, N_pad - N), (0, 0)))

    # ---- reduction-axis tiling (k is the last grid axis) -------------------
    # Keep the (triple-buffered, bf16) x + w1 streams plus the f32 accumulator under
    # the VMEM budget; BD is 512-aligned (lane-aligned for x, sublane-aligned for w1).
    acc_bytes = BN * HH * 4
    fixed_bytes = acc_bytes + 4 * HH * 4 + 2 * N_pad * 4 + 64 * 1024   # acc + params + out + slack
    avail = max(vmem_stream_budget - fixed_bytes, 512 * 2 * (BN + HH))
    bytes_per_bd = 3 * 2 * (BN + HH)             # 3 buffers, bf16, x-row + w1-column per BD
    BD_max = max(512, (avail // bytes_per_bd) // 512 * 512)
    D_rounded = ((D + 511) // 512) * 512
    BD = min(BD_max, D_rounded)
    num_k = -(-D // BD)                          # ceil
    D_pad = num_k * BD

    # ---- one-time parameter / input layout plumbing (tiny) -----------------
    x2d = x2d.astype(jnp.bfloat16)
    w1t = jnp.transpose(w1).astype(jnp.bfloat16)           # (D, HH)
    if D_pad != D:
        # zero-pad the contraction axis (exact: contributes nothing to the dot)
        x2d = jnp.pad(x2d, ((0, 0), (0, D_pad - D)))
        w1t = jnp.pad(w1t, ((0, D_pad - D), (0, 0)))
    b1r = b1.reshape(1, HH).astype(jnp.float32)
    w2r = w2.reshape(1, HH).astype(jnp.float32)
    b2r = b2.reshape(1,).astype(jnp.float32)

    # Deeper pipeline on the streamed inputs only when the k-loop is long enough
    # for it to matter (demo shapes run num_k == 1 and skip this path).
    stream_kwargs = dict(pipeline_mode=pl.Buffered(3)) if num_k >= 4 else {}
    x_spec = pl.BlockSpec((BN, BD), lambda i, k: (i, k), **stream_kwargs)
    w1_spec = pl.BlockSpec((BD, HH), lambda i, k: (k, 0), **stream_kwargs)

    out = pl.pallas_call(
        fcnn_kernel,
        out_shape=jax.ShapeDtypeStruct((1, N_pad), jnp.float32),
        grid_spec=pltpu.PrefetchScalarGridSpec(
            num_scalar_prefetch=0,
            grid=(N_pad // BN, num_k),
            in_specs=[
                x_spec,                                              # x tile (bf16)
                w1_spec,                                             # fc1 weight chunk (bf16)
                pl.BlockSpec((1, HH), lambda i, k: (0, 0)),          # fc1 bias
                pl.BlockSpec((1, HH), lambda i, k: (0, 0)),          # fc2 weight row
                pl.BlockSpec(memory_space=pltpu.MemorySpace.SMEM),   # fc2 bias scalar
            ],
            out_specs=pl.BlockSpec((1, BN), lambda i, k: (0, i)),    # lane-dense output
            scratch_shapes=[pltpu.VMEM((BN, HH), jnp.float32)],
        ),
        compiler_params=pltpu.CompilerParams(
            dimension_semantics=("parallel", "arbitrary"),
            vmem_limit_bytes=32 * 1024 * 1024,
        ),
    )(x2d, w1t, b1r, w2r, b2r)

    return out[0, :N].reshape(N, 1)


def fcnn_reference(x, w1, b1, w2, b2):
    """Pure-JAX f32 reference mirroring the PyTorch FCNN forward (activation = ReLU)."""
    xf = x.reshape(x.shape[0], -1).astype(jnp.float32)
    h = jnp.maximum(xf @ w1.T + b1, 0.0)
    z = h @ w2.T + b2
    return jax.nn.sigmoid(z)


if __name__ == "__main__":
    key = jax.random.PRNGKey(0)
    k_x, k_w1, k_b1, k_w2, k_b2 = jax.random.split(key, 5)

    # Small shapes consistent with the module: input_shape=(4,16,16) -> D=1024, hidden=128.
    N, C, H, W = 2, 4, 16, 16
    D = C * H * W
    HH = 128                      # model_options['hidden_neurons'] (small demo value)

    x = jax.random.normal(k_x, (N, C, H, W), dtype=jnp.float32)
    w1 = 0.05 * jax.random.normal(k_w1, (HH, D), dtype=jnp.float32)   # fc1 weight (torch layout)
    b1 = 0.05 * jax.random.normal(k_b1, (HH,), dtype=jnp.float32)
    w2 = 0.05 * jax.random.normal(k_w2, (1, HH), dtype=jnp.float32)   # fc2 weight (torch layout)
    b2 = 0.05 * jax.random.normal(k_b2, (1,), dtype=jnp.float32)

    out = fcnn_forward(x, w1, b1, w2, b2)
    out = jax.block_until_ready(out)

    ref = fcnn_reference(x, w1, b1, w2, b2)
    assert out.shape == (N, 1), out.shape
    # bf16 streaming of x / w1 (f32 accumulator) -> relaxed tolerance vs f32 reference.
    assert jnp.allclose(out, ref, atol=1e-2, rtol=1e-2), (out, ref)

    print("KERNEL_OK")
</pallas_src>

<mosaic_0001>
module attributes {stable_mosaic.version = 11 : i64} {
  func.func @fcnn_kernel(%arg0: i32, %arg1: i32, %arg2: memref<8x1024xbf16, #tpu.memory_space<vmem>>, %arg3: memref<1024x128xbf16, #tpu.memory_space<vmem>>, %arg4: memref<1x128xf32, #tpu.memory_space<vmem>>, %arg5: memref<1x128xf32, #tpu.memory_space<vmem>>, %arg6: memref<1xf32, #tpu.memory_space<smem>>, %arg7: memref<1x8xf32, #tpu.memory_space<vmem>>, %arg8: memref<8x128xf32, #tpu.memory_space<vmem>>) attributes {dimension_semantics = [#tpu.dimension_semantics<parallel>, #tpu.dimension_semantics<arbitrary>], iteration_bounds = array<i64: 1, 1>, scalar_prefetch = 0 : i64, scratch_operands = 1 : i64, tpu.core_type = #tpu.core_type<tc>, window_params = [{transform_indices = @transform_0, window_bounds = array<i64: 8, 1024>}, {transform_indices = @transform_1, window_bounds = array<i64: 1024, 128>}, {pipeline_mode = #tpu.pipeline_mode<synchronous>, transform_indices = @transform_2, window_bounds = array<i64: 1, 128>}, {pipeline_mode = #tpu.pipeline_mode<synchronous>, transform_indices = @transform_3, window_bounds = array<i64: 1, 128>}, {transform_indices = @transform_4, window_bounds = array<i64: 1>}, {transform_indices = @transform_5, window_bounds = array<i64: 1, 8>}]} {
    %c0_i32 = arith.constant 0 : i32
    %0 = arith.cmpi eq, %arg1, %c0_i32 : i32
    %1 = arith.extui %0 : i1 to i32
    %c0_i32_0 = arith.constant 0 : i32
    %2 = arith.cmpi ne, %1, %c0_i32_0 : i32
    scf.if %2 {
      %cst_10 = arith.constant 0.000000e+00 : f32
      %12 = vector.broadcast %cst_10 : f32 to vector<8x128xf32>
      %c0_11 = arith.constant 0 : index
      %c0_12 = arith.constant 0 : index
      %13 = vector.load %arg8[%c0_11, %c0_12] : memref<8x128xf32, #tpu.memory_space<vmem>>, vector<8x128xf32>
      tpu.vector_store %arg8[%c0_11, %c0_12], %12 {strides = array<i32>} : memref<8x128xf32, #tpu.memory_space<vmem>>, vector<8x128xf32>,
    } else {
    }
    %c0 = arith.constant 0 : index
    %c0_1 = arith.constant 0 : index
    %3 = vector.load %arg8[%c0, %c0_1] : memref<8x128xf32, #tpu.memory_space<vmem>>, vector<8x128xf32>
    %c0_2 = arith.constant 0 : index
    %c0_3 = arith.constant 0 : index
    %4 = vector.load %arg2[%c0_2, %c0_3] : memref<8x1024xbf16, #tpu.memory_space<vmem>>, vector<8x1024xbf16>
    %c0_4 = arith.constant 0 : index
    %c0_5 = arith.constant 0 : index
    %5 = vector.load %arg3[%c0_4, %c0_5] : memref<1024x128xbf16, #tpu.memory_space<vmem>>, vector<1024x128xbf16>
    %cst = arith.constant dense<0.000000e+00> : vector<8x128xf32>
    %6 = tpu.matmul %4, %5, %cst {dimension_numbers = #tpu.dot_dimension_numbers<[1], [0], [0], [1], [0, 0, 1, 1], [], []>} : vector<8x1024xbf16>, vector<1024x128xbf16>, vector<8x128xf32> -> vector<8x128xf32>
    %7 = arith.addf %3, %6 : vector<8x128xf32>
    %c0_6 = arith.constant 0 : index
    %c0_7 = arith.constant 0 : index
    %8 = vector.load %arg8[%c0_6, %c0_7] : memref<8x128xf32, #tpu.memory_space<vmem>>, vector<8x128xf32>
    tpu.vector_store %arg8[%c0_6, %c0_7], %7 {strides = array<i32>} : memref<8x128xf32, #tpu.memory_space<vmem>>, vector<8x128xf32>,
    %c0_i32_8 = arith.constant 0 : i32
    %9 = arith.cmpi eq, %arg1, %c0_i32_8 : i32
    %10 = arith.extui %9 : i1 to i32
    %c0_i32_9 = arith.constant 0 : i32
    %11 = arith.cmpi ne, %10, %c0_i32_9 : i32
    scf.if %11 {
      %c0_10 = arith.constant 0 : index
      %c0_11 = arith.constant 0 : index
      %12 = vector.load %arg8[%c0_10, %c0_11] : memref<8x128xf32, #tpu.memory_space<vmem>>, vector<8x128xf32>
      %c0_12 = arith.constant 0 : index
      %c0_13 = arith.constant 0 : index
      %13 = vector.load %arg4[%c0_12, %c0_13] : memref<1x128xf32, #tpu.memory_space<vmem>>, vector<1x128xf32>
      %14 = vector.broadcast %13 : vector<1x128xf32> to vector<8x128xf32>
      %15 = arith.addf %12, %14 : vector<8x128xf32>
      %cst_14 = arith.constant 0.000000e+00 : f32
      %16 = vector.broadcast %cst_14 : f32 to vector<8x128xf32>
      %17 = arith.maximumf %15, %16 : vector<8x128xf32>
      %c0_15 = arith.constant 0 : index
      %c0_16 = arith.constant 0 : index
      %18 = vector.load %arg5[%c0_15, %c0_16] : memref<1x128xf32, #tpu.memory_space<vmem>>, vector<1x128xf32>
      %cst_17 = arith.constant dense<0.000000e+00> : vector<1x8xf32>
      %19 = tpu.matmul %18, %17, %cst_17 {dimension_numbers = #tpu.dot_dimension_numbers<[1], [1], [0], [0], [0, 0, 1, 0], [], []>} : vector<1x128xf32>, vector<8x128xf32>, vector<1x8xf32> -> vector<1x8xf32>
      %c0_18 = arith.constant 0 : index
      %20 = memref.load %arg6[%c0_18] : memref<1xf32, #tpu.memory_space<smem>>
      %21 = vector.broadcast %20 : f32 to vector<1x8xf32>
      %22 = arith.addf %19, %21 : vector<1x8xf32>
      %23 = math.absf %22 : vector<1x8xf32>
      %cst_19 = arith.constant 0.000000e+00 : f32
      %24 = vector.broadcast %cst_19 : f32 to vector<1x8xf32>
      %25 = arith.subf %24, %23 : vector<1x8xf32>
      %26 = math.exp %25 : vector<1x8xf32>
      %cst_20 = arith.constant 0.000000e+00 : f32
      %27 = vector.broadcast %cst_20 : f32 to vector<1x8xf32>
      %28 = arith.cmpf oge, %22, %27 : vector<1x8xf32>
      %cst_21 = arith.constant 1.000000e+00 : f32
      %29 = vector.broadcast %cst_21 : f32 to vector<1x8xf32>
      %30 = arith.addf %29, %26 : vector<1x8xf32>
      %cst_22 = arith.constant 1.000000e+00 : f32
      %31 = vector.broadcast %cst_22 : f32 to vector<1x8xf32>
      %32 = arith.divf %31, %30 : vector<1x8xf32>
      %cst_23 = arith.constant 1.000000e+00 : f32
      %33 = vector.broadcast %cst_23 : f32 to vector<1x8xf32>
      %34 = arith.addf %33, %26 : vector<1x8xf32>
      %35 = arith.divf %26, %34 : vector<1x8xf32>
      %36 = arith.select %28, %32, %35 : vector<1x8xi1>, vector<1x8xf32>
      %c0_24 = arith.constant 0 : index
      %c0_25 = arith.constant 0 : index
      %37 = vector.load %arg7[%c0_24, %c0_25] : memref<1x8xf32, #tpu.memory_space<vmem>>, vector<1x8xf32>
      tpu.vector_store %arg7[%c0_24, %c0_25], %36 {strides = array<i32>} : memref<1x8xf32, #tpu.memory_space<vmem>>, vector<1x8xf32>,
    } else {
    }
    return
  }
  func.func @transform_0(%arg0: i32, %arg1: i32) -> (i32, i32) {
    %c0_i32 = arith.constant 0 : i32
    return %arg0, %arg1 : i32, i32
  }
  func.func @transform_1(%arg0: i32, %arg1: i32) -> (i32, i32) {
    %c0_i32 = arith.constant 0 : i32
    %c0_i32_0 = arith.constant 0 : i32
    return %arg1, %c0_i32 : i32, i32
  }
  func.func @transform_2(%arg0: i32, %arg1: i32) -> (i32, i32) {
    %c0_i32 = arith.constant 0 : i32
    %c0_i32_0 = arith.constant 0 : i32
    %c0_i32_1 = arith.constant 0 : i32
    return %c0_i32, %c0_i32_0 : i32, i32
  }
  func.func @transform_3(%arg0: i32, %arg1: i32) -> (i32, i32) {
    %c0_i32 = arith.constant 0 : i32
    %c0_i32_0 = arith.constant 0 : i32
    %c0_i32_1 = arith.constant 0 : i32
    return %c0_i32, %c0_i32_0 : i32, i32
  }
  func.func @transform_4(%arg0: i32, %arg1: i32) -> i32 {
    %c0_i32 = arith.constant 0 : i32
    %c0_i32_0 = arith.constant 0 : i32
    return %c0_i32 : i32
  }
  func.func @transform_5(%arg0: i32, %arg1: i32) -> (i32, i32) {
    %c0_i32 = arith.constant 0 : i32
    %c0_i32_0 = arith.constant 0 : i32
    return %c0_i32, %arg0 : i32, i32
  }
}

</mosaic_0001>

<bundles_post_ra>
// kernel: tpu_custom_call.1
= control target key start
LH: loop header
LB: loop body
LE: loop exit
PB: predicated region body
PF: predicated region fallthrough
CT: control target
= control target key end

     0   :  { %11 = vsyncpa [#allocation5], 0  ;;  %s1287_s0 = inlined_call_operand.hbm [shape: bf16[8,1024], index: 0, kind: input, shape index: {}]   ;;  %s1288_s1 = inlined_call_operand.hbm [shape: bf16[1024,128], index: 1, kind: input, shape index: {}]   ;;  %s1289_s2 = inlined_call_operand.vmem [shape: f32[1,128], index: 2, kind: input, shape index: {}]   ;;  %s1290_s3 = inlined_call_operand.vmem [shape: f32[1,128], index: 3, kind: input, shape index: {}]   ;;  %s1291_s4 = inlined_call_operand.<no memory space> [shape: f32[1], index: 4, kind: input, shape index: {}]   ;;  %s1292_s5 = inlined_call_operand.hbm [shape: f32[1,8], index: 5, kind: output, shape index: {}]  }
   0x1   :  { %12 = vsyncpa [#allocation8], 0 }
   0x2   :  { %13 = vsyncpa [#allocation6], 0  ;;  %s1198_s18 = smov [#allocation4]   ;;  %s1199_s20 = smov [#allocation7]  }
   0x3   :  { %s20_s19 = sshll.u32 %s1198_s18, 4  ;;  %s29_s21 = sshll.u32 %s1199_s20, 4  ;;  %s21_s19 = int_to_ptr.vmem [resolvable:$true] %s20_s19  ;;  %s1235_s21 = int_to_ptr.vmem [resolvable:$true] %s29_s21 }
   0x4   :  { %s1126_s24 = scalar_lea.hbm %s1287_s0, 512 }
   0x5   :  { %p1127_p0 = scmp.ne.s32.totalorder %s1287_s0, %s1126_s24  ;;  %p1130_p1 = scmp.lt.u32.totalorder %s1126_s24, %s1287_s0 }
   0x7   :  { %p1132_p2 = pnand %p1130_p1, %p1127_p0 }
   0x9   :  { %1135 = shalt.err (!%p1132_p2)
}
   0xa   :  { %s1136_s29 = scalar_lea.vmem %s21_s19, 512  ;;  %p1141_p4 = scmp.lt.s32.totalorder %s21_s19, %s21_s19 }
   0xb   :  { %p1137_p3 = scmp.ne.s32.totalorder %s21_s19, %s1136_s29  ;;  %p1142_p5 = scmp.lt.s32.totalorder %s1136_s29, %s1136_s29 }
   0xd   :  { %p1143_p6 = por %p1142_p5, %p1141_p4 }
   0xf   :  { %p1144_p7 = pnand %p1143_p6, %p1137_p3 }
  0x11   :  { %1147 = shalt.err (!%p1144_p7)
}
  0x12   :  { %23 = dma.hbm_to_vmem [thread:$0]  %s1287_s0, 512, %s21_s19, [#allocation5]  }
  0x13   :  { %s1148_s9 = scalar_lea.hbm %s1288_s1, 8192 }
  0x14   :  { %p1149_p8 = scmp.ne.s32.totalorder %s1288_s1, %s1148_s9  ;;  %p1152_p9 = scmp.lt.u32.totalorder %s1148_s9, %s1288_s1 }
  0x16   :  { %p1154_p10 = pnand %p1152_p9, %p1149_p8 }
  0x18   :  { %1157 = shalt.err (!%p1154_p10)
}
  0x19   :  { %s1158_s14 = scalar_lea.vmem %s1235_s21, 8192  ;;  %p1163_p12 = scmp.lt.s32.totalorder %s1235_s21, %s1235_s21 }
  0x1a   :  { %p1159_p11 = scmp.ne.s32.totalorder %s1235_s21, %s1158_s14  ;;  %p1164_p13 = scmp.lt.s32.totalorder %s1158_s14, %s1158_s14 }
  0x1c   :  { %p1165_p0 = por %p1164_p13, %p1163_p12 }
  0x1e   :  { %p1166_p1 = pnand %p1165_p0, %p1159_p11 }
  0x20   :  { %1169 = shalt.err (!%p1166_p1)
}
  0x21   :  { %s1200_s0 = smov 64   ;;  %s1201_s15 = smov 4  }
  0x22   :  { %35 = dma.hbm_to_vmem [thread:$0]  %s1288_s1, 8192, %s1235_s21, [#allocation8], %s1200_s0, %s1200_s0, %s1201_s15  }
  0x23   :  { %1192 = dma.done.wait [#allocation5], 512  }
  0x24   :  { %1193 = vsyncadd [#allocation5], 4294966784 }
  0x25   :  { %1194 = dma.done.wait [#allocation8], 8192  }
  0x26   :  { %1195 = vsyncadd [#allocation8], 4294959104  ;;  %v1050_v0 = vld [vmem:[#allocation7 + $0x40] sm:$0xff]   ;;  %v1054_v4 = vld [vmem:[#allocation7 + $0x48] sm:$0xff]   ;;  %vm1203_vm0 = vmmov 0   ;;  %vm857_vm1 = vcmask 57344  }
  0x27   :  { %v1051_v1 = vld [vmem:[#allocation7 + $0xc0] sm:$0xff]   ;;  %948 = vmatprep.subr.bf16.mxu0 %v1050_v0  ;;  %v1055_v5 = vld [vmem:[#allocation7 + $0xc8] sm:$0xff]   ;;  %v1058_v8 = vld [vmem:[#allocation7 + $0x50] sm:$0xff]  }
  0x28   :  { %v1052_v2 = vld [vmem:[#allocation7] sm:$0xff]   ;;  %970 = vmatprep.subr.bf16.mxu1 %v1051_v1  ;;  %v1056_v6 = vld [vmem:[#allocation7 + $0x8] sm:$0xff]   ;;  %v1059_v9 = vld [vmem:[#allocation7 + $0xd0] sm:$0xff]  }
  0x29   :  { %v1053_v3 = vld [vmem:[#allocation7 + $0x80] sm:$0xff]   ;;  %949 = vmatpush3.bf16.msra.mxu0 %v1052_v2  ;;  %v1057_v7 = vld [vmem:[#allocation7 + $0x88] sm:$0xff]   ;;  %v1060_v10 = vld [vmem:[#allocation7 + $0x10] sm:$0xff]  }
  0x2a   :  { %971 = vmatpush3.bf16.msra.mxu1 %v1053_v3  ;;  %950 = vmatprep.subr.bf16.mxu0 %v1054_v4  ;;  %v1061_v11 = vld [vmem:[#allocation7 + $0x90] sm:$0xff]   ;;  %v1062_v12 = vld [vmem:[#allocation7 + $0x58] sm:$0xff]   ;;  %v1066_v16 = vld [vmem:[#allocation7 + $0x60] sm:$0xff]  }
  0x2b   :  { %972 = vmatprep.subr.bf16.mxu1 %v1055_v5  ;;  %v1063_v13 = vld [vmem:[#allocation7 + $0xd8] sm:$0xff]   ;;  %v1067_v17 = vld [vmem:[#allocation7 + $0xe0] sm:$0xff]   ;;  %v1070_v20 = vld [vmem:[#allocation7 + $0x68] sm:$0xff]  }
  0x2c   :  { %v1064_v14 = vld [vmem:[#allocation7 + $0x18] sm:$0xff]   ;;  %v1068_v18 = vld [vmem:[#allocation7 + $0x20] sm:$0xff]   ;;  %v1071_v21 = vld [vmem:[#allocation7 + $0xe8] sm:$0xff]  }
  0x2d   :  { %951 = vmatpush3.bf16.msra.mxu0 %v1056_v6  ;;  %v1065_v15 = vld [vmem:[#allocation7 + $0x98] sm:$0xff]   ;;  %v1069_v19 = vld [vmem:[#allocation7 + $0xa0] sm:$0xff]   ;;  %v1072_v22 = vld [vmem:[#allocation7 + $0x28] sm:$0xff]  }
  0x2e   :  { %973 = vmatpush3.bf16.msra.mxu1 %v1057_v7  ;;  %952 = vmatprep.subr.bf16.mxu0 %v1058_v8  ;;  %v1073_v23 = vld [vmem:[#allocation7 + $0xa8] sm:$0xff]   ;;  %v1074_v24 = vld [vmem:[#allocation7 + $0x70] sm:$0xff]   ;;  %v1078_v28 = vld [vmem:[#allocation7 + $0x78] sm:$0xff]  }
  0x2f   :  { %974 = vmatprep.subr.bf16.mxu1 %v1059_v9  ;;  %v1075_v25 = vld [vmem:[#allocation7 + $0xf0] sm:$0xff]   ;;  %v1079_v29 = vld [vmem:[#allocation7 + $0xf8] sm:$0xff]   ;;  %v55_v32 = vld [vmem:[#allocation4] sm:$0xff] }
  0x30   :  { %v1076_v26 = vld [vmem:[#allocation7 + $0x30] sm:$0xff]   ;;  %v1080_v30 = vld [vmem:[#allocation7 + $0x38] sm:$0xff]   ;;  %v56_v33 = vld [vmem:[#allocation4 + $0x8] sm:$0xff]  ;;  %v875_v34 = vcombine.low %v55_v32, %v55_v32  ;;  %v876_v35 = vcombine.high %v55_v32, %v55_v32 }
  0x31   :  { %953 = vmatpush3.bf16.msra.mxu0 %v1060_v10  ;;  %v1077_v27 = vld [vmem:[#allocation7 + $0xb0] sm:$0xff]   ;;  %v1081_v31 = vld [vmem:[#allocation7 + $0xb8] sm:$0xff]   ;;  %v877_v36 = vcombine.low %v56_v33, %v56_v33  ;;  %v878_v37 = vcombine.high %v56_v33, %v56_v33  ;;  %v1086_v38 = vld [vmem:[#allocation7 + $0x140] sm:$0xff]  }
  0x32   :  { %975 = vmatpush3.bf16.msra.mxu1 %v1061_v11  ;;  %954 = vmatprep.subr.bf16.mxu0 %v1062_v12  ;;  %v1087_v39 = vld [vmem:[#allocation7 + $0x1c0] sm:$0xff]   ;;  %v1090_v42 = vld [vmem:[#allocation7 + $0x148] sm:$0xff]   ;;  %v1094_v46 = vld [vmem:[#allocation7 + $0x150] sm:$0xff]   ;;  %v1202_v12 = vmov 0.0  }
  0x33   :  { %976 = vmatprep.subr.bf16.mxu1 %v1063_v13  ;;  %631 = vmatprep.mubr.bf16.mxu0 %v876_v35  ;;  %v1088_v40 = vld [vmem:[#allocation7 + $0x100] sm:$0xff]   ;;  %v1091_v43 = vld [vmem:[#allocation7 + $0x1c8] sm:$0xff]   ;;  %v1095_v47 = vld [vmem:[#allocation7 + $0x1d0] sm:$0xff]  }
  0x34   :  { %671 = vmatprep.mubr.bf16.mxu1 %v878_v37  ;;  %v1089_v41 = vld [vmem:[#allocation7 + $0x180] sm:$0xff]   ;;  %v1092_v44 = vld [vmem:[#allocation7 + $0x108] sm:$0xff]   ;;  %v1096_v48 = vld [vmem:[#allocation7 + $0x110] sm:$0xff]  }
  0x35   :  { %955 = vmatpush3.bf16.msra.mxu0 %v1064_v14  ;;  %v1093_v45 = vld [vmem:[#allocation7 + $0x188] sm:$0xff]   ;;  %v1097_v49 = vld [vmem:[#allocation7 + $0x190] sm:$0xff]   ;;  %v1098_v50 = vld [vmem:[#allocation7 + $0x158] sm:$0xff]  }
  0x36   :  { %977 = vmatpush3.bf16.msra.mxu1 %v1065_v15  ;;  %956 = vmatprep.subr.bf16.mxu0 %v1066_v16  ;;  %v1099_v51 = vld [vmem:[#allocation7 + $0x1d8] sm:$0xff]   ;;  %v1102_v54 = vld [vmem:[#allocation7 + $0x160] sm:$0xff]   ;;  %v1106_v58 = vld [vmem:[#allocation7 + $0x168] sm:$0xff]  }
  0x37   :  { %978 = vmatprep.subr.bf16.mxu1 %v1067_v17  ;;  %v1100_v52 = vld [vmem:[#allocation7 + $0x118] sm:$0xff]   ;;  %v1103_v55 = vld [vmem:[#allocation7 + $0x1e0] sm:$0xff]   ;;  %v1107_v59 = vld [vmem:[#allocation7 + $0x1e8] sm:$0xff]  }
  0x38   :  { %v1101_v53 = vld [vmem:[#allocation7 + $0x198] sm:$0xff]   ;;  %v1104_v56 = vld [vmem:[#allocation7 + $0x120] sm:$0xff]   ;;  %v1108_v60 = vld [vmem:[#allocation7 + $0x128] sm:$0xff]  }
  0x39   :  { %957 = vmatpush3.bf16.msra.mxu0 %v1068_v18  ;;  %v1105_v57 = vld [vmem:[#allocation7 + $0x1a0] sm:$0xff]   ;;  %v1109_v61 = vld [vmem:[#allocation7 + $0x1a8] sm:$0xff]   ;;  %v1110_v62 = vld [vmem:[#allocation7 + $0x170] sm:$0xff]  }
  0x3a   :  { %979 = vmatpush3.bf16.msra.mxu1 %v1069_v19  ;;  %958 = vmatprep.subr.bf16.mxu0 %v1070_v20  ;;  %v1111_v63 = vld [vmem:[#allocation7 + $0x1f0] sm:$0xff]   ;;  %v1114_v2 = vld [vmem:[#allocation7 + $0x178] sm:$0xff]   ;;  %v947_v35 = vld [vmem:[%s1289_s2] ss:$0 sm:$0xff]  ;;  %s1204_s2 = smov [#allocation9]  }
  0x3b   :  { %980 = vmatprep.subr.bf16.mxu1 %v1071_v21  ;;  %v1112_v0 = vld [vmem:[#allocation7 + $0x130] sm:$0xff]   ;;  %v1115_v3 = vld [vmem:[#allocation7 + $0x1f8] sm:$0xff]   ;;  %s865_s23 = sshll.u32 %s1204_s2, 4  ;;  %s866_s23 = int_to_ptr.vmem [resolvable:$true] %s865_s23 }
  0x3c   :  { %v1113_v1 = vld [vmem:[#allocation7 + $0x1b0] sm:$0xff]   ;;  %v1116_v4 = vld [vmem:[#allocation7 + $0x138] sm:$0xff]   ;;  %p1175_p3 = scmp.lt.s32.totalorder %s866_s23, %s866_s23 }
  0x3d   :  { %959 = vmatpush3.bf16.msra.mxu0 %v1072_v22  ;;  %v1117_v5 = vld [vmem:[#allocation7 + $0x1b8] sm:$0xff]   ;;  %v57_v6 = vld [vmem:[#allocation4 + $0x10] sm:$0xff] }
  0x3e   :  { %981 = vmatpush3.bf16.msra.mxu1 %v1073_v23  ;;  %960 = vmatprep.subr.bf16.mxu0 %v1074_v24  ;;  %v879_v7 = vcombine.low %v57_v6, %v57_v6  ;;  %v880_v8 = vcombine.high %v57_v6, %v57_v6  ;;  %v58_v9 = vld [vmem:[#allocation4 + $0x18] sm:$0xff] }
  0x3f   :  { %982 = vmatprep.subr.bf16.mxu1 %v1075_v25  ;;  %v881_v10 = vcombine.low %v58_v9, %v58_v9  ;;  %v882_v11 = vcombine.high %v58_v9, %v58_v9 }
  0x41   :  { %961 = vmatpush3.bf16.msra.mxu0 %v1076_v26 }
  0x42   :  { %983 = vmatpush3.bf16.msra.mxu1 %v1077_v27  ;;  %962 = vmatprep.subr.bf16.mxu0 %v1078_v28 }
  0x43   :  { %984 = vmatprep.subr.bf16.mxu1 %v1079_v29 }
  0x45   :  { %963 = vmatpush3.bf16.msra.mxu0 %v1080_v30 }
  0x46   :  { %985 = vmatpush3.bf16.msra.mxu1 %v1081_v31  ;;  %992 = vmatprep.subr.bf16.mxu0 %v1086_v38 }
  0x47   :  { %1014 = vmatprep.subr.bf16.mxu1 %v1087_v39  ;;  %v774_v39 = vld [vmem:[%s1290_s3] sm:$0x1]  ;;  %s1170_s3 = scalar_lea.vmem %s866_s23, 16 }
  0x48   :  { %632 = vmatmul.mubr.bf16.vlgmr.msra.gmra.mrb[0].mxu0 %v875_v34  ;;  %p1171_p2 = scmp.ne.s32.totalorder %s866_s23, %s1170_s3 }
  0x49   :  { %672 = vmatmul.mubr.bf16.vlgmr.msra.gmra.mrb[0].mxu1 %v877_v36  ;;  %993 = vmatpush3.bf16.msra.mxu0 %v1088_v40  ;;  %v776_v40 = vstv %s1291_s4  ;;  %s1174_s4 = scalar_lea.vmem %s866_s23, 32 }
  0x4a   :  { %1015 = vmatpush3.bf16.msra.mxu1 %v1089_v41  ;;  %994 = vmatprep.subr.bf16.mxu0 %v1090_v42  ;;  %p1176_p4 = scmp.lt.s32.totalorder %s1174_s4, %s1170_s3 }
  0x4b   :  { %1016 = vmatprep.subr.bf16.mxu1 %v1091_v43  ;;  %711 = vmatprep.mubr.bf16.mxu0 %v880_v8 }
  0x4c   :  { %751 = vmatprep.mubr.bf16.mxu1 %v882_v11  ;;  %p1177_p5 = por %p1176_p4, %p1175_p3 }
  0x4d   :  { %995 = vmatpush3.bf16.msra.mxu0 %v1092_v44 }
  0x4e   :  { %1017 = vmatpush3.bf16.msra.mxu1 %v1093_v45  ;;  %996 = vmatprep.subr.bf16.mxu0 %v1094_v46  ;;  %p1178_p6 = pnand %p1177_p5, %p1171_p2 }
  0x4f   :  { %1018 = vmatprep.subr.bf16.mxu1 %v1095_v47 }
  0x51   :  { %997 = vmatpush3.bf16.msra.mxu0 %v1096_v48 }
  0x52   :  { %1019 = vmatpush3.bf16.msra.mxu1 %v1097_v49  ;;  %998 = vmatprep.subr.bf16.mxu0 %v1098_v50 }
  0x53   :  { %1020 = vmatprep.subr.bf16.mxu1 %v1099_v51 }
  0x55   :  { %999 = vmatpush3.bf16.msra.mxu0 %v1100_v52 }
  0x56   :  { %1021 = vmatpush3.bf16.msra.mxu1 %v1101_v53  ;;  %1000 = vmatprep.subr.bf16.mxu0 %v1102_v54 }
  0x57   :  { %1022 = vmatprep.subr.bf16.mxu1 %v1103_v55 }
  0x59   :  { %1001 = vmatpush3.bf16.msra.mxu0 %v1104_v56 }
  0x5a   :  { %1023 = vmatpush3.bf16.msra.mxu1 %v1105_v57  ;;  %1002 = vmatprep.subr.bf16.mxu0 %v1106_v58 }
  0x5b   :  { %1024 = vmatprep.subr.bf16.mxu1 %v1107_v59 }
  0x5d   :  { %1003 = vmatpush3.bf16.msra.mxu0 %v1108_v60 }
  0x5e   :  { %1025 = vmatpush3.bf16.msra.mxu1 %v1109_v61  ;;  %1004 = vmatprep.subr.bf16.mxu0 %v1110_v62 }
  0x5f   :  { %1026 = vmatprep.subr.bf16.mxu1 %v1111_v63 }
  0x61   :  { %1005 = vmatpush3.bf16.msra.mxu0 %v1112_v0 }
  0x62   :  { %1027 = vmatpush3.bf16.msra.mxu1 %v1113_v1  ;;  %1006 = vmatprep.subr.bf16.mxu0 %v1114_v2 }
  0x63   :  { %1028 = vmatprep.subr.bf16.mxu1 %v1115_v3 }
  0x65   :  { %1007 = vmatpush3.bf16.msra.mxu0 %v1116_v4 }
  0x66   :  { %1029 = vmatpush3.bf16.msra.mxu1 %v1117_v5  ;;  %1038 = vmatprep.subr.mxu0 %v1202_v12 }
  0x68   :  { %712 = vmatmul.mubr.bf16.vlgmr.msra.gmra.mrb[4].mxu0 %v879_v7 }
  0x69   :  { %752 = vmatmul.mubr.bf16.vlgmr.msra.gmra.mrb[4].mxu1 %v881_v10  ;;  %1040 = vmatprep.mubr.msk.f32.mxu0 %vm1203_vm0, %v1202_v12 }
 0x11b   :  { %v964_v13 = vpop.f32.mrb[0].mxu0 }
 0x11c   :  { %v986_v14 = vpop.f32.mrb[0].mxu1  ;;  %v965_v15 = vpop.f32.mrb[1].mxu0 }
 0x11d   :  { %v987_v16 = vpop.f32.mrb[1].mxu1  ;;  %v966_v17 = vadd.f32 %v965_v15, %v964_v13  ;;  %v967_v19 = vpop.f32.mrb[2].mxu0 }
 0x11e   :  { %v988_v18 = vadd.f32 %v987_v16, %v986_v14  ;;  %v989_v20 = vpop.f32.mrb[2].mxu1  ;;  %v968_v21 = vpop.f32.mrb[3].mxu0 }
 0x11f   :  { %v990_v22 = vpop.f32.mrb[3].mxu1 }
 0x120   :  { %v674_v23 = vadd.f32 %v988_v18, %v966_v17 }
 0x13b   :  { %v1008_v24 = vpop.f32.mrb[4].mxu0 }
 0x13c   :  { %v1030_v25 = vpop.f32.mrb[4].mxu1  ;;  %v1009_v26 = vpop.f32.mrb[5].mxu0 }
 0x13d   :  { %v1031_v27 = vpop.f32.mrb[5].mxu1  ;;  %v1010_v28 = vadd.f32 %v1009_v26, %v1008_v24  ;;  %v1011_v30 = vpop.f32.mrb[6].mxu0 }
 0x13e   :  { %v1032_v29 = vadd.f32 %v1031_v27, %v1030_v25  ;;  %v1033_v31 = vpop.f32.mrb[6].mxu1  ;;  %v1012_v32 = vpop.f32.mrb[7].mxu0 }
 0x13f   :  { %v1034_v33 = vpop.f32.mrb[7].mxu1  ;;  %v714_v34 = vadd.f32 %v1010_v28, %v674_v23 }
 0x141   :  { %v754_v36 = vadd.f32 %v1032_v29, %v714_v34 }
 0x143   :  { %v772_v37 = vadd.f32 %v947_v35, %v754_v36 }
 0x145   :  { %v773_v38 = vmax.f32 %v772_v37, 0.0 }
 0x147   :  { %1039 = vmatpush3.xpose.msra.mxu0 %v773_v38 }
 0x14a   :  { %1041 = vmatmul.mubr.f32.vlgmr.msra.gmra.mrb[8].mxu0 %v774_v39 }
 0x21d   :  { %v843_v41 = vpop.f32.mrb[8].mxu0 }
 0x21e   :  { %v844_v42 = vadd.f32 %v843_v41, %v776_v40  ;;  %v1042_v43 = vpop.f32.mrb[9].mxu0 }
 0x220   :  { %v847_v44 = vand.u32 2147483647, %v844_v42  ;;  %vm851_vm2 = vcmp.ge.f32.partialorder %v844_v42, 0.0 }
 0x222   :  { %v848_v45 = vsub.f32 0.0, %v847_v44 }
 0x224   :  { %v849_v46 = vmul.f32 1.442695, %v848_v45 }
 0x226   :  { %1122 = vpow2.f32 %v849_v46 }
 0x230   :  { %v1123_v47 = vpop.eup %1122 }
 0x231   :  { %v852_v48 = vadd.f32 1.0, %v1123_v47 }
 0x233   :  { %1124 = vrcp.f32 %v852_v48 }
 0x23d   :  { %v1125_v49 = vpop.eup %1124 }
 0x23e   :  { %v855_v50 = vmul.f32 %v1125_v49, %v1123_v47 }
 0x240   :  { %v856_v51 = vsel %vm851_vm2, %v1125_v49, %v855_v50 }
 0x241   :  { %858 = vst.msk [vmem:[#allocation9] sm:$0x1] %vm857_vm1, %v856_v51 }
 0x242   :  { %1181 = shalt.err (!%p1178_p6)
}
 0x243   :  { %s1182_s26 = scalar_lea.hbm %s1292_s5, 16 }
 0x244   :  { %p1183_p7 = scmp.ne.s32.totalorder %s1292_s5, %s1182_s26  ;;  %p1186_p8 = scmp.lt.u32.totalorder %s1182_s26, %s1292_s5 }
 0x246   :  { %p1188_p9 = pnand %p1186_p8, %p1183_p7 }
 0x248   :  { %1191 = shalt.err (!%p1188_p9)
}
 0x249   :  { %868 = dma.vmem_to_hbm [thread:$0]  %s866_s23, 16, %s1292_s5, [#allocation6]  }
 0x24a   :  { %1196 = dma.done.wait [#allocation6], 16  }
 0x24b   :  { %1197 = vsyncadd [#allocation6], 4294967280 }
 0x24c   :  { %872 = vsyncpa [#allocation5], 1 }
 0x24d   :  { %873 = vsyncpa [#allocation8], 1 }
 0x24e   :  { %874 = vsyncpa [#allocation6], 1 }

</bundles_post_ra>
